<compile_context>
chip_gen: v7x
topology: tpu7x:2x2x1
jax: 0.10.0
libtpu: 0.0.40
codegen_flags: <defaults>
</compile_context>

<pallas_src>
import functools

import jax
import jax.numpy as jnp
from jax.experimental import pallas as pl
from jax.experimental.pallas import tpu as pltpu


# --------------------------------------------------------------------------- #
# Kernel body
# --------------------------------------------------------------------------- #
def _layernorm2d_kernel(x_ref, w_ref, b_ref, o_ref, *, eps, inv_c, mxu_sums):
    # x_ref / o_ref: (C, T_HW) tile (batch dim squeezed away).
    # w_ref / b_ref: (C, 1) float32 per-channel affine parameters.
    x = x_ref[...].astype(jnp.float32)                    # (C, T_HW)
    if mxu_sums:
        # Offload the two channel sums to the MXU (idle otherwise); frees
        # VALU/XLU passes on the bf16 path where the crossover is tight.
        ones = jnp.ones((1, x.shape[0]), jnp.float32)     # (1, C)
        u = jnp.dot(ones, x, preferred_element_type=jnp.float32) * inv_c
        d = x - u                                          # (C, T_HW)
        s = jnp.dot(ones, d * d, preferred_element_type=jnp.float32) * inv_c
    else:
        u = jnp.mean(x, axis=0, keepdims=True)             # (1, T_HW)
        d = x - u                                          # (C, T_HW)
        s = jnp.mean(d * d, axis=0, keepdims=True)         # (1, T_HW)
    inv = jax.lax.rsqrt(s + eps)                            # EUP, free slot
    # Fused affine: (x - u) * (inv * w) + b  (w, b broadcast over lanes).
    o_ref[...] = (d * (inv * w_ref[...]) + b_ref[...]).astype(o_ref.dtype)


# --------------------------------------------------------------------------- #
# Tile-size / VMEM budgeting helpers
# --------------------------------------------------------------------------- #
def _round_up(x: int, m: int) -> int:
    return (x + m - 1) // m * m


def _largest_dividing_tile(hw_pad: int, cap: int) -> int:
    """Largest multiple of 128 that is <= cap and exactly divides hw_pad."""
    cap = max(128, min(cap, hw_pad) // 128 * 128)
    for t in range(cap, 127, -128):
        if hw_pad % t == 0:
            return t
    return 128  # hw_pad is a multiple of 128, so 128 always divides it.


def _vmem_limit_bytes() -> int:
    """Per-chip VMEM limit: 3/4 of physical, capped at 96 MiB.

    v7x (64 MiB physical) -> 48 MiB; v5e/v6e (128 MiB) -> 96 MiB.  Falls back
    to the v7x-safe assumption if the hardware query is unavailable.
    """
    phys = 64 * 1024 * 1024
    try:
        info = pltpu.get_tpu_info()
        phys = int(getattr(info, "vmem_capacity_bytes", phys)) or phys
    except Exception:
        pass
    return min(phys * 3 // 4, 96 * 1024 * 1024)


def _pick_hw_tile(hw_pad: int, c: int, in_itemsize: int, out_itemsize: int,
                  n: int, block_budget_bytes: int) -> int:
    """Byte-budgeted spatial tile (multiple of 128, exact divisor of hw_pad)."""
    # Per-lane footprint per grid step: double-buffered input + output blocks
    # plus ~3 full-tile f32 temporaries (upcast, d, product/result).
    bytes_per_lane = c * (2 * in_itemsize + 2 * out_itemsize + 12)
    t_max = max(128, block_budget_bytes // bytes_per_lane)
    t_hw = _largest_dividing_tile(hw_pad, t_max)
    # v7x megacore: guarantee >= 2 total grid steps so both TensorCores run.
    if n * (hw_pad // t_hw) < 2 and hw_pad >= 256:
        t_hw = _largest_dividing_tile(hw_pad, hw_pad // 2)
    return t_hw


# --------------------------------------------------------------------------- #
# Wrapper
# --------------------------------------------------------------------------- #
def layernorm2d(x, weight, bias, eps: float = 1e-6, mxu_channel_sums=None):
    """x: (N, C, H, W) NCHW; weight/bias: (C,).  Returns (N, C, H, W)."""
    N, C, H, W = x.shape
    HW = H * W

    in_itemsize = jnp.dtype(x.dtype).itemsize
    out_itemsize = in_itemsize
    if mxu_channel_sums is None:
        # Only the 16-bit I/O path sits near the VALU/HBM crossover on v6e/v7x.
        mxu_channel_sums = in_itemsize <= 2

    vmem_limit = _vmem_limit_bytes()
    block_budget = vmem_limit - 2 * 1024 * 1024  # headroom for params/misc

    # Pad the spatial axis to a multiple of 128 so stores stay lane-dense
    # (biggest measured lever for small H*W maps like 7x7 / 14x14).
    hw_pad = _round_up(HW, 128)
    t_hw = _pick_hw_tile(hw_pad, C, in_itemsize, out_itemsize, N, block_budget)

    # Robustness guard: ensure the limit covers at least one set of blocks.
    footprint = C * t_hw * (2 * in_itemsize + 2 * out_itemsize + 12)
    vmem_limit = max(vmem_limit, footprint + 4 * 1024 * 1024)

    x2 = x.reshape(N, C, HW)
    if hw_pad != HW:
        # Zero padding: padded lanes see mean=0/var=0 -> finite output, cropped.
        x2 = jnp.pad(x2, ((0, 0), (0, 0), (0, hw_pad - HW)))

    # Hoist the f32 cast of the affine parameters out of the hot loop.
    w2 = weight.astype(jnp.float32).reshape(C, 1)
    b2 = bias.astype(jnp.float32).reshape(C, 1)

    grid = (N, hw_pad // t_hw)

    out = pl.pallas_call(
        functools.partial(_layernorm2d_kernel, eps=eps, inv_c=1.0 / C,
                          mxu_sums=mxu_channel_sums),
        out_shape=jax.ShapeDtypeStruct((N, C, hw_pad), x.dtype),
        grid_spec=pltpu.PrefetchScalarGridSpec(
            num_scalar_prefetch=0,
            grid=grid,
            in_specs=[
                # Squeezed batch dim -> kernel sees a clean (C, T_HW) 2-D ref.
                pl.BlockSpec((pl.Squeezed(), C, t_hw), lambda n, s: (n, 0, s)),
                # Constant index_map: parameters are not re-DMA'd per step.
                pl.BlockSpec((C, 1), lambda n, s: (0, 0)),
                pl.BlockSpec((C, 1), lambda n, s: (0, 0)),
            ],
            out_specs=pl.BlockSpec((pl.Squeezed(), C, t_hw),
                                   lambda n, s: (n, 0, s)),
        ),
        compiler_params=pltpu.CompilerParams(
            # Reduction is entirely inside the block (over C), so both grid
            # axes are embarrassingly parallel.  HW stays the fastest-varying
            # axis so consecutive steps DMA contiguous HBM ranges.
            dimension_semantics=("parallel", "parallel"),
            vmem_limit_bytes=int(vmem_limit),
        ),
    )(x2, w2, b2)

    if hw_pad != HW:
        out = out[:, :, :HW]
    return out.reshape(N, C, H, W)


# --------------------------------------------------------------------------- #
# Pure-JAX reference (PyTorch semantics)
# --------------------------------------------------------------------------- #
def layernorm2d_ref(x, weight, bias, eps: float = 1e-6):
    u = jnp.mean(x, axis=1, keepdims=True)
    s = jnp.mean((x - u) ** 2, axis=1, keepdims=True)
    xn = (x - u) / jnp.sqrt(s + eps)
    return weight[None, :, None, None] * xn + bias[None, :, None, None]


if __name__ == "__main__":
    key = jax.random.PRNGKey(0)
    kx, kw, kb, kx2 = jax.random.split(key, 4)

    # ---- f32 path, HW a multiple of 128, multi-step grid ------------------ #
    N, C, H, W = 2, 4, 16, 16
    x = jax.random.normal(kx, (N, C, H, W), dtype=jnp.float32)
    # Module init is ones/zeros; perturb slightly so the affine path is live.
    weight = jnp.ones((C,), jnp.float32) + 0.1 * jax.random.normal(kw, (C,), jnp.float32)
    bias = 0.1 * jax.random.normal(kb, (C,), jnp.float32)

    out = jax.block_until_ready(layernorm2d(x, weight, bias))
    ref = layernorm2d_ref(x, weight, bias)
    assert out.shape == (N, C, H, W)
    assert jnp.allclose(out, ref, atol=1e-5, rtol=1e-5), float(jnp.max(jnp.abs(out - ref)))

    # ---- bf16 path + small non-128-multiple HW (lane padding + MXU sums) -- #
    N2, C2, H2, W2 = 1, 8, 7, 7
    xb = jax.random.normal(kx2, (N2, C2, H2, W2), dtype=jnp.bfloat16)
    wb = jnp.ones((C2,), jnp.float32)
    bb = jnp.zeros((C2,), jnp.float32)

    outb = jax.block_until_ready(layernorm2d(xb, wb, bb))
    refb = layernorm2d_ref(xb.astype(jnp.float32), wb, bb)
    assert outb.shape == (N2, C2, H2, W2)
    assert jnp.allclose(outb.astype(jnp.float32), refb, atol=5e-2, rtol=5e-2), \
        float(jnp.max(jnp.abs(outb.astype(jnp.float32) - refb)))

    print("KERNEL_OK")
</pallas_src>

<mosaic_0001>
module attributes {stable_mosaic.version = 11 : i64} {
  func.func @_layernorm2d_kernel(%arg0: i32, %arg1: i32, %arg2: memref<1x4x256xf32, #tpu.memory_space<vmem>>, %arg3: memref<4x1xf32, #tpu.memory_space<vmem>>, %arg4: memref<4x1xf32, #tpu.memory_space<vmem>>, %arg5: memref<1x4x256xf32, #tpu.memory_space<vmem>>) attributes {dimension_semantics = [#tpu.dimension_semantics<parallel>, #tpu.dimension_semantics<parallel>], iteration_bounds = array<i64: 2, 1>, scalar_prefetch = 0 : i64, scratch_operands = 0 : i64, tpu.core_type = #tpu.core_type<tc>, window_params = [{transform_indices = @transform_0, window_bounds = array<i64: 1, 4, 256>}, {pipeline_mode = #tpu.pipeline_mode<synchronous>, transform_indices = @transform_1, window_bounds = array<i64: 4, 1>}, {pipeline_mode = #tpu.pipeline_mode<synchronous>, transform_indices = @transform_2, window_bounds = array<i64: 4, 1>}, {transform_indices = @transform_3, window_bounds = array<i64: 1, 4, 256>}]} {
    %c0 = arith.constant 0 : index
    %c0_0 = arith.constant 0 : index
    %c0_1 = arith.constant 0 : index
    %0 = vector.load %arg2[%c0, %c0_0, %c0_1] : memref<1x4x256xf32, #tpu.memory_space<vmem>>, vector<1x4x256xf32>
    %1 = vector.shape_cast %0 : vector<1x4x256xf32> to vector<4x256xf32>
    %cst = arith.constant dense<0.000000e+00> : vector<256xf32>
    %2 = vector.multi_reduction <add>, %1, %cst [0] : vector<4x256xf32> to vector<256xf32>
    %3 = vector.shape_cast %2 : vector<256xf32> to vector<1x256xf32>
    %cst_2 = arith.constant 4.000000e+00 : f32
    %4 = vector.broadcast %cst_2 : f32 to vector<1x256xf32>
    %5 = arith.divf %3, %4 : vector<1x256xf32>
    %6 = vector.broadcast %5 : vector<1x256xf32> to vector<4x256xf32>
    %7 = arith.subf %1, %6 : vector<4x256xf32>
    %8 = arith.mulf %7, %7 : vector<4x256xf32>
    %cst_3 = arith.constant dense<0.000000e+00> : vector<256xf32>
    %9 = vector.multi_reduction <add>, %8, %cst_3 [0] : vector<4x256xf32> to vector<256xf32>
    %10 = vector.shape_cast %9 : vector<256xf32> to vector<1x256xf32>
    %cst_4 = arith.constant 4.000000e+00 : f32
    %11 = vector.broadcast %cst_4 : f32 to vector<1x256xf32>
    %12 = arith.divf %10, %11 : vector<1x256xf32>
    %cst_5 = arith.constant 9.99999997E-7 : f32
    %13 = vector.broadcast %cst_5 : f32 to vector<1x256xf32>
    %14 = arith.addf %12, %13 : vector<1x256xf32>
    %15 = math.rsqrt %14 : vector<1x256xf32>
    %c0_6 = arith.constant 0 : index
    %c0_7 = arith.constant 0 : index
    %16 = vector.load %arg3[%c0_6, %c0_7] : memref<4x1xf32, #tpu.memory_space<vmem>>, vector<4x1xf32>
    %17 = vector.broadcast %15 : vector<1x256xf32> to vector<4x256xf32>
    %18 = vector.broadcast %16 : vector<4x1xf32> to vector<4x256xf32>
    %19 = arith.mulf %17, %18 : vector<4x256xf32>
    %20 = arith.mulf %7, %19 : vector<4x256xf32>
    %c0_8 = arith.constant 0 : index
    %c0_9 = arith.constant 0 : index
    %21 = vector.load %arg4[%c0_8, %c0_9] : memref<4x1xf32, #tpu.memory_space<vmem>>, vector<4x1xf32>
    %22 = vector.broadcast %21 : vector<4x1xf32> to vector<4x256xf32>
    %23 = arith.addf %20, %22 : vector<4x256xf32>
    %c0_10 = arith.constant 0 : index
    %c0_11 = arith.constant 0 : index
    %c0_12 = arith.constant 0 : index
    %24 = vector.load %arg5[%c0_10, %c0_11, %c0_12] : memref<1x4x256xf32, #tpu.memory_space<vmem>>, vector<1x4x256xf32>
    %25 = vector.shape_cast %24 : vector<1x4x256xf32> to vector<4x256xf32>
    %26 = vector.shape_cast %23 : vector<4x256xf32> to vector<1x4x256xf32>
    tpu.vector_store %arg5[%c0_10, %c0_11, %c0_12], %26 {strides = array<i32>} : memref<1x4x256xf32, #tpu.memory_space<vmem>>, vector<1x4x256xf32>,
    return
  }
  func.func @transform_0(%arg0: i32, %arg1: i32) -> (i32, i32, i32) {
    %c0_i32 = arith.constant 0 : i32
    %c0_i32_0 = arith.constant 0 : i32
    return %arg0, %c0_i32, %arg1 : i32, i32, i32
  }
  func.func @transform_1(%arg0: i32, %arg1: i32) -> (i32, i32) {
    %c0_i32 = arith.constant 0 : i32
    %c0_i32_0 = arith.constant 0 : i32
    %c0_i32_1 = arith.constant 0 : i32
    return %c0_i32, %c0_i32_0 : i32, i32
  }
  func.func @transform_2(%arg0: i32, %arg1: i32) -> (i32, i32) {
    %c0_i32 = arith.constant 0 : i32
    %c0_i32_0 = arith.constant 0 : i32
    %c0_i32_1 = arith.constant 0 : i32
    return %c0_i32, %c0_i32_0 : i32, i32
  }
  func.func @transform_3(%arg0: i32, %arg1: i32) -> (i32, i32, i32) {
    %c0_i32 = arith.constant 0 : i32
    %c0_i32_0 = arith.constant 0 : i32
    return %arg0, %c0_i32, %arg1 : i32, i32, i32
  }
}

</mosaic_0001>

<bundles_post_ra>
// kernel: tpu_custom_call.1
= control target key start
LH: loop header
LB: loop body
LE: loop exit
PB: predicated region body
PF: predicated region fallthrough
CT: control target
= control target key end

     0   :  { %8 = vsyncpa [#allocation3], 0  ;;  %s798_s0 = inlined_call_operand.hbm [shape: f32[2,4,256], index: 0, kind: input, shape index: {}]   ;;  %s799_s1 = inlined_call_operand.vmem [shape: f32[4,1], index: 1, kind: input, shape index: {}]   ;;  %s800_s2 = inlined_call_operand.vmem [shape: f32[4,1], index: 2, kind: input, shape index: {}]   ;;  %s801_s3 = inlined_call_operand.hbm [shape: f32[2,4,256], index: 3, kind: output, shape index: {}]  }
   0x1   :  { %10 = vsyncpa [#allocation3 + $0x1], 0 }
   0x2   :  { %11 = vsyncpa [#allocation4], 0 }
   0x3   :  { %13 = vsyncpa [#allocation4 + $0x1], 0  ;;  %s612_s12 = smov 0   ;;  %s614_s13 = smov 0  }
   0x4   :  { %s616_s14 = smov 0   ;;  %s618_s15 = smov 0  }
   0x5   :  { %s620_s16 = smov 0   ;;  %s622_s17 = smov 0  }
   0x6 LB: > { %s387_s18 = sadd.s32 4294967295, %s586_s17   ;;  %s388_s19 = sadd.s32 4294967294, %s586_s17   ;;  %s586_s17 = sphi %s622_s17, %s19_s17   ;;  %s582_s16 = sphi %s620_s16, %s817_s16   ;;  %s578_s15 = sphi %s618_s15, %s816_s15   ;;  %s574_s14 = sphi %s616_s14, %s815_s14   ;;  %s570_s13 = sphi %s614_s13, %s814_s13   ;;  %s566_s12 = sphi %s612_s12, %s813_s12  }
   0x7   : > { %s31_s20 = sadd.s32 1, %s582_s16  ;;  %s40_s21 = sadd.s32 1, %s574_s14 }
   0x8   : > { %p33_p0 = scmp.ge.s32.totalorder %s31_s20, 2  ;;  %p47_p1 = scmp.ne.s32.totalorder %s574_s14, %s570_s13 }
   0x9   : > { %p48_p2 = scmp.eq.s32.totalorder %s586_s17, 0  ;;  %p53_p3 = scmp.ne.s32.totalorder %s570_s13, %s566_s12 }
   0xa   : > { %s819_s20 = smov (%p33_p0, %s31_s20), 0  ;;  %p54_p5 = scmp.eq.s32.totalorder %s387_s18, 0 }
   0xb   : > { %p653_p4 = por %p48_p2, %p47_p1  ;;  %s35_s23 = ssub.s32 %s582_s16, %s819_s20 }
   0xc   : > { %p121_p6 = scmp.eq.s32.totalorder %s387_s18, 1  ;;  %p38_p7 = scmp.eq.s32.totalorder %s35_s23, 0 }
   0xd   : > { %p659_p8 = por %p54_p5, %p53_p3  ;;  %p127_p10 = scmp.eq.s32.totalorder %s388_s19, 1 }
   0xe   : > { %p663_p9 = por %p121_p6, %p47_p1  ;;  %p416_p13 = scmp.lt.s32.totalorder %s586_s17, 2 }
   0xf   : > { %s668_s26 = scalar_select %p38_p7, %s574_s14, %s40_s21  }
  0x10   : > { %s805_s25 = scalar_select %p663_p9, 1, 0 }
  0x11   : > { %p670_p11 = por %p127_p10, %p53_p3  ;;  %s153_s28 = sand.u32 1, %s574_s14  }
  0x12   : > { %s391_s29 = sshll.u32 %s153_s28, 3  ;;  %s402_s30 = sshll.u32 %s582_s16, 7 }
  0x13   : > { %s806_s27 = scalar_select %p670_p11, 1, 0 }
  0x14   : > { %s681_s6 = scalar_lea.hbm %s798_s0, %s402_s30  ;;  %s157_s7 = scalar_lea.vmem [#allocation2], %s391_s29 }
  0x15   : > { %s167_s8 = sshll.u32 %s157_s7, 4  ;;  %p687_p0 = pnand %p416_p13, %p653_p4  ;;  %s683_s8 = int_to_ptr.vmem [resolvable:$true] %s167_s8 }
  0x16   : > { %s154_s10 = scalar_lea.sflag [#allocation3], %s153_s28  ;;  %s474_s11 = scalar_lea.hbm %s681_s6, 128 }
  0x17   : > { %p475_p3 = scmp.ne.s32.totalorder %s681_s6, %s474_s11  ;;  %p476_p5 = pneg %p687_p0 }
  0x18   : > { %s479_s21 = scalar_lea.hbm %s798_s0, 256  ;;  %p480_p4 = scmp.lt.u32.totalorder %s681_s6, %s798_s0 }
  0x19   : > { %p477_p6 = pnand %p476_p5, %p475_p3  ;;  %p481_p10 = scmp.lt.u32.totalorder %s479_s21, %s474_s11 }
  0x1a   : > { %p483_p12 = scmp.lt.u32.totalorder %s474_s11, %s681_s6 }
  0x1b   : > { %p478_p7 = pneg %p477_p6  ;;  %p482_p13 = por %p481_p10, %p480_p4 }
  0x1d   : > { %p484_p1 = por %p483_p12, %p482_p13 }
  0x1f   : > { %p485_p2 = pnand %p484_p1, %p478_p7 }
  0x21   : > { %488 = shalt.err (!%p485_p2)
}
  0x22   : > { %s489_s28 = scalar_lea.vmem %s683_s8, 128  ;;  %s588_s29 = smov [#allocation2]  }
  0x23   : > { %p490_p3 = scmp.ne.s32.totalorder %s683_s8, %s489_s28  ;;  %s494_s30 = sshll.u32 %s588_s29, 4  ;;  %s495_s30 = int_to_ptr.vmem [resolvable:$false] %s494_s30 }
  0x24   : > { %s496_s4 = scalar_lea.vmem %s495_s30, 256  ;;  %p497_p9 = scmp.lt.s32.totalorder %s683_s8, %s495_s30 }
  0x25   : > { %p492_p6 = pnand %p490_p3, %p476_p5  ;;  %p498_p4 = scmp.lt.s32.totalorder %s496_s4, %s489_s28 }
  0x27   : > { %p493_p11 = pneg %p492_p6  ;;  %p499_p10 = por %p498_p4, %p497_p9 }
  0x29   : > { %p500_p12 = pnand %p499_p10, %p493_p11 }
  0x2b   : > { %503 = shalt.err (!%p500_p12)
}
  0x2c   : > { %411 = dma.hbm_to_vmem [thread:$0]  (!%p687_p0), %s681_s6, 128, %s683_s8, %s154_s10  }
  0x2d   : > { %p808_p1 = scmp.lt.s32.totalorder %s586_s17, 3  ;;  %p809_p2 = scmp.ge.s32.totalorder %s586_s17, 1 }
  0x2f   : > { %p173_p5 = pnand %p809_p2, %p808_p1 }
  0x30   : > { %s723_s5 = sand.u32 (!%p173_p5), 1, %s570_s13  }
  0x31   : > { %176 = sbr.rel (%p173_p5) target bundleno = 209 (0xd1), region = 32  ;;  %s395_s7 = sshll.u32 (!%p173_p5), %s723_s5, 3 }
  0x32   : > { %s179_s11 = scalar_lea.sflag (!%p173_p5), [#allocation3], %s723_s5  ;;  %s182_s9 = scalar_lea.vmem (!%p173_p5), [#allocation2], %s395_s7 }
  0x38   : > { %557 = dma.done.wait (%p659_p8), %s179_s11, 128  }
  0x39   : > { %559 = vsyncadd (%p659_p8), %s179_s11, 4294967168  ;;  %v589_v0 = vmov 0   ;;  %v258_v1 = vld [vmem:[%s799_s1] sm:$0xf]  ;;  %vm211_vm0 = vcmask 1043456   ;;  %v279_v45 = vlaneseq  ;;  %s403_s24 = sshll.u32 %s578_s15, 7 }
  0x3a   : > { %468 = vset.pattern.permute.xlu0 %v589_v0  ;;  %v271_v2 = vld [vmem:[%s800_s2] sm:$0xf]  ;;  %v590_v43 = vmov 839922192   ;;  %s204_s19 = scalar_lea.vmem [#allocation5], %s395_s7  ;;  %s749_s28 = scalar_lea.hbm %s801_s3, %s403_s24 }
  0x3b   : > { %261 = vperm.xlu0 %468, %v258_v1   ;;  %v207_v3 = vld [vmem:[%s182_s9] sm:$0xff]  ;;  %v277_v44 = vunpack.c.l.s4 %v590_v43  ;;  %v280_v48 = vshrl.u32 %v279_v45, 7  ;;  %s303_s21 = sshll.u32 %s204_s19, 4  ;;  %s287_s29 = scalar_lea.sflag [#allocation4], %s723_s5  ;;  %s751_s21 = int_to_ptr.vmem [resolvable:$true] %s303_s21 }
  0x3c   : > { %v209_v4 = vcombine.high %v207_v3, %v207_v3  ;;  %v212_v5 = vsel %vm211_vm0, %v207_v3, 0.0  ;;  %s504_s30 = scalar_lea.vmem %s751_s21, 128  ;;  %p810_p9 = scmp.ne.s32.totalorder %s805_s25, 0 }
  0x3d   : > { %v213_v7 = vrot.slane %v212_v5, 4  ;;  %v278_v47 = vunpack.c.0.s8 %v277_v44  ;;  %p505_p8 = scmp.ne.s32.totalorder %s751_s21, %s504_s30  ;;  %s591_s15 = smov [#allocation5]  }
  0x3e   : > { %v219_v6 = vsel %vm211_vm0, %v209_v4, 0.0  ;;  %s508_s4 = sshll.u32 %s591_s15, 4  ;;  %s509_s4 = int_to_ptr.vmem [resolvable:$false] %s508_s4 }
  0x3f   : > { %274 = vperm.xlu0 %468, %v271_v2   ;;  %v220_v8 = vrot.slane %v219_v6, 4  ;;  %v214_v9 = vadd.f32 %v213_v7, %v212_v5  ;;  %v281_v53 = vsub.s32 %v278_v47, %v280_v48  ;;  %p506_p11 = pnand %p505_p8, %p810_p9  ;;  %s510_s7 = scalar_lea.vmem %s509_s4, 256 }
  0x40   : > { %p511_p7 = scmp.lt.s32.totalorder %s751_s21, %s509_s4  ;;  %p512_p13 = scmp.lt.s32.totalorder %s510_s7, %s504_s30 }
  0x41   : > { %v221_v10 = vadd.f32 %v220_v8, %v219_v6  ;;  %v215_v11 = vrot.slane %v214_v9, 2  ;;  %p507_p0 = pneg %p506_p11 }
  0x42   : > { %p513_p3 = por %p512_p13, %p511_p7 }
  0x43   : > { %v222_v12 = vrot.slane %v221_v10, 2  ;;  %v216_v13 = vadd.f32 %v215_v11, %v214_v9 }
  0x44   : > { %p514_p6 = pnand %p513_p3, %p507_p0 }
  0x45   : > { %v223_v14 = vadd.f32 %v222_v12, %v221_v10  ;;  %v217_v15 = vrot.slane %v216_v13, 1 }
  0x47   : > { %v224_v16 = vrot.slane %v223_v14, 1  ;;  %v218_v17 = vadd.f32 %v217_v15, %v216_v13 }
  0x49   : > { %v225_v18 = vadd.f32 %v224_v16, %v223_v14  ;;  %v227_v19 = vmul.f32 0.25, %v218_v17 }
  0x4b   : > { %v228_v20 = vmul.f32 0.25, %v225_v18 }
  0x4d   : > { %v231_v21 = vcombine.low %v227_v19, %v228_v20 }
  0x4f   : > { %v233_v22 = vsub.f32 %v207_v3, %v231_v21 }
  0x51   : > { %v234_v23 = vmul.f32 %v233_v22, %v233_v22 }
  0x53   : > { %v236_v24 = vcombine.high %v234_v23, %v234_v23  ;;  %v238_v25 = vsel %vm211_vm0, %v234_v23, 0.0 }
  0x54   : > { %v239_v27 = vrot.slane %v238_v25, 4 }
  0x55   : > { %v245_v26 = vsel %vm211_vm0, %v236_v24, 0.0 }
  0x56   : > { %v246_v28 = vrot.slane %v245_v26, 4  ;;  %v240_v29 = vadd.f32 %v239_v27, %v238_v25 }
  0x58   : > { %v247_v30 = vadd.f32 %v246_v28, %v245_v26  ;;  %v241_v31 = vrot.slane %v240_v29, 2 }
  0x5a   : > { %v248_v32 = vrot.slane %v247_v30, 2  ;;  %v242_v33 = vadd.f32 %v241_v31, %v240_v29 }
  0x5c   : > { %v249_v34 = vadd.f32 %v248_v32, %v247_v30  ;;  %v243_v35 = vrot.slane %v242_v33, 1 }
  0x5e   : > { %v250_v36 = vrot.slane %v249_v34, 1  ;;  %v244_v37 = vadd.f32 %v243_v35, %v242_v33 }
  0x60   : > { %v251_v38 = vadd.f32 %v250_v36, %v249_v34  ;;  %v252_v39 = vmul.f32 0.25, %v244_v37 }
  0x62   : > { %v253_v40 = vmul.f32 0.25, %v251_v38  ;;  %v254_v41 = vadd.f32 1e-06, %v252_v39 }
  0x64   : > { %v255_v42 = vadd.f32 1e-06, %v253_v40  ;;  %470 = vrsqrt.f32 %v254_v41 }
  0x66   : > { %472 = vrsqrt.f32 %v255_v42 }
  0x6e   : > { %v471_v46 = vpop.eup %470 }
  0x70   : > { %v473_v49 = vpop.eup %472 }
  0xba   : > { %v262_v50 = vpop.permute.xlu0 %261 }
  0xbb   : > { %v264_v51 = vmul.f32 %v471_v46, %v262_v50  ;;  %v265_v52 = vmul.f32 %v473_v49, %v262_v50 }
  0xbd   : > { %v268_v54 = vcombine.low %v264_v51, %v265_v52 }
  0xbe   : > { %v275_v55 = vpop.permute.xlu0 %274 }
  0xbf   : > { %v270_v56 = vmul.f32 %v268_v54, %v233_v22  ;;  %v282_v57 = vrot.slane %v275_v55, %v281_v53 }
  0xc1   : > { %v284_v58 = vadd.f32 %v282_v57, %v270_v56 }
  0xc3   : > { %285 = vst [vmem:[%s204_s19] sm:$0xff] %v284_v58 }
  0xc4   : > { %517 = shalt.err (!%p514_p6)
}
  0xc5   : > { %s518_s5 = scalar_lea.hbm %s749_s28, 128  ;;  %s522_s6 = scalar_lea.hbm %s801_s3, 256 }
  0xc6   : > { %p519_p4 = scmp.ne.s32.totalorder %s749_s28, %s518_s5  ;;  %p523_p1 = scmp.lt.u32.totalorder %s749_s28, %s801_s3 }
  0xc7   : > { %p524_p2 = scmp.lt.u32.totalorder %s522_s6, %s518_s5  ;;  %p526_p8 = scmp.lt.u32.totalorder %s518_s5, %s749_s28 }
  0xc8   : > { %p520_p10 = pnand %p519_p4, %p810_p9 }
  0xc9   : > { %p525_p5 = por %p524_p2, %p523_p1 }
  0xca   : > { %p521_p12 = pneg %p520_p10 }
  0xcb   : > { %p527_p11 = por %p526_p8, %p525_p5 }
  0xcd   : > { %p528_p0 = pnand %p527_p11, %p521_p12 }
  0xcf   : > { %531 = shalt.err (!%p528_p0)
}
  0xd0   : > { %406 = dma.vmem_to_hbm [thread:$0]  (%p810_p9), %s751_s21, 128, %s749_s28, %s287_s29  }
  0xd1 PF: > { %s315_s18 = sand.u32 1, %s566_s12   ;;  %p811_p7 = scmp.ne.s32.totalorder %s806_s27, 0 }
  0xd2   : > { %p812_p13 = scmp.ge.s32.totalorder %s586_s17, 2  ;;  %s316_s24 = scalar_lea.sflag [#allocation4], %s315_s18 }
  0xd4   : > { %p413_p3 = pnand %p812_p13, %p811_p7 }
  0xd6   : > { %561 = dma.done.wait (!%p413_p3), %s316_s24, 128  }
  0xd7   : > { %563 = vsyncadd (!%p413_p3), %s316_s24, 4294967168  ;;  %s19_s17 = sadd.s32 1, %s586_s17   ;;  %s813_s12 = smov %s570_s13 }
  0xd8   : > { %p16_p6 = scmp.ge.s32.totalorder %s19_s17, 4   ;;  %s814_s13 = smov %s574_s14 }
  0xd9   : > { %s815_s14 = smov %s668_s26  ;;  %s816_s15 = smov %s582_s16 }
  0xda   : > { %s817_s16 = smov %s819_s20  ;;  %18 = sbr.rel (!%p16_p6) target bundleno = 6 (0x6), region = 77 }
  0xe1   :  { %321 = vsyncpa [#allocation3], 1 }
  0xe2   :  { %323 = vsyncpa [#allocation3 + $0x1], 1 }
  0xe3   :  { %324 = vsyncpa [#allocation4], 1 }
  0xe4   :  { %326 = vsyncpa [#allocation4 + $0x1], 1 }

</bundles_post_ra>
